<compile_context>
chip_gen: v6e
topology: v6e:2x2x1
jax: 0.10.0
libtpu: 0.0.40
codegen_flags: <defaults>
</compile_context>

<pallas_src>
import functools

import jax
import jax.numpy as jnp
from jax.experimental import pallas as pl
from jax.experimental.pallas import tpu as pltpu

_MiB = 1024 * 1024


# ----------------------------------------------------------------------------
# Generation-aware configuration.
# ----------------------------------------------------------------------------
def _detect_vmem_bytes():
    try:
        info = pltpu.get_tpu_info()
        v = getattr(info, "vmem_capacity_bytes", None)
        if v is not None and int(v) > 0:
            return int(v)
    except Exception:
        pass
    return None


_VMEM_BYTES = _detect_vmem_bytes()

if _VMEM_BYTES is not None and _VMEM_BYTES >= 96 * _MiB:
    # v5e / v6e class: 128 MiB VMEM, 1 TensorCore per chip.
    _TF_CAP = 1024
    _TM_CAP_TILED = 512
    _TM_CAP_FUSED = 256
    _TILED_VMEM_LIMIT = 80 * _MiB
    _FUSED_VMEM_LIMIT = 96 * _MiB
    _FUSED_MAX_BYTES = 56 * _MiB
    _NUM_TC = 1
elif _VMEM_BYTES is not None:
    # v7x class: 64 MiB VMEM per TensorCore, 2 TensorCores per chip.
    _TF_CAP = 1024
    _TM_CAP_TILED = 512
    _TM_CAP_FUSED = 256
    _TILED_VMEM_LIMIT = 44 * _MiB
    _FUSED_VMEM_LIMIT = 48 * _MiB
    _FUSED_MAX_BYTES = 28 * _MiB
    _NUM_TC = 2
else:
    # Detection failed: do NOT demote tile sizes, but keep VMEM budgets that
    # are safe for the smallest (64 MiB) generation.
    _TF_CAP = 1024
    _TM_CAP_TILED = 512
    _TM_CAP_FUSED = 256
    _TILED_VMEM_LIMIT = 40 * _MiB
    _FUSED_VMEM_LIMIT = 44 * _MiB
    _FUSED_MAX_BYTES = 24 * _MiB
    _NUM_TC = 2


def _round_up(x, m):
    return ((x + m - 1) // m) * m


def _pad_feature(d):
    """Pad a feature dim only to the next multiple of 128 (no blow-up)."""
    return _round_up(max(d, 1), 128)


def _pad_batch(b):
    """Pad batch only to the next multiple of 8 (no blow-up)."""
    return _round_up(max(b, 1), 8)


def _pick_tile(padded, cap, step):
    """Largest tile <= cap (multiple of `step`) that divides `padded`."""
    start = min(cap, padded)
    start -= start % step
    start = max(start, step)
    for t in range(start, step - 1, -step):
        if padded % t == 0:
            return t
    return step


# ----------------------------------------------------------------------------
# Kernel 1: fully fused MLP (all layers in one kernel, activations in VMEM)
# ----------------------------------------------------------------------------
def _fused_mlp_kernel(*refs, n_layers, use_bias, skip_connections):
    x_ref = refs[0]
    o_ref = refs[-1]
    wb = refs[1:-1]

    h_mm = x_ref[...]                                   # bf16, feeds MXU directly
    h_res = h_mm.astype(jnp.float32) if skip_connections else None
    y = None
    idx = 0
    for li in range(n_layers):
        w_ref = wb[idx]
        idx += 1
        y = jnp.dot(h_mm, w_ref[...], preferred_element_type=jnp.float32)
        if use_bias:
            y = y + wb[idx][...]                        # f32 bias [1, Dout]
            idx += 1
        if skip_connections:
            y = y + h_res                               # skip-add BEFORE activation
        if li != n_layers - 1:
            y = jnp.maximum(y, 0.0)
            h_mm = y.astype(jnp.bfloat16)               # bf16 intermediates (half bytes)
            if skip_connections:
                h_res = y                               # f32 residual stream
    o_ref[...] = y.astype(o_ref.dtype)


def pallas_mlp_fused(x, layer_params, *, use_bias, skip_connections, out_dtype):
    """x: [M, D0_pad] bf16; layer_params: [(w_pad bf16, b_pad f32 | None), ...]."""
    M, D0 = x.shape
    tm = _pick_tile(M, _TM_CAP_FUSED, 8)
    # On 2-TensorCore chips make sure the parallel batch grid has >= 2 steps.
    while (M // tm) < _NUM_TC and tm % 16 == 0:
        tm //= 2
    assert M % tm == 0
    n_layers = len(layer_params)
    DL = layer_params[-1][0].shape[1]

    kernel = functools.partial(_fused_mlp_kernel, n_layers=n_layers,
                               use_bias=use_bias,
                               skip_connections=skip_connections)

    def build(single_buffer_weights):
        weight_kwargs = {}
        if single_buffer_weights:
            # Constant-index blocks: keep a single VMEM copy instead of 2.
            weight_kwargs = dict(pipeline_mode=pl.Buffered(1))
        args = [x]
        in_specs = [pl.BlockSpec((tm, D0), lambda i: (i, 0))]
        flops = 0
        bytes_acc = x.nbytes + M * DL * jnp.dtype(out_dtype).itemsize
        for w, b in layer_params:
            din, dout = w.shape
            args.append(w)
            in_specs.append(pl.BlockSpec((din, dout), lambda i: (0, 0),
                                         **weight_kwargs))
            flops += 2 * M * din * dout
            bytes_acc += w.nbytes
            if use_bias:
                args.append(b)
                in_specs.append(pl.BlockSpec((1, dout), lambda i: (0, 0),
                                             **weight_kwargs))
                bytes_acc += b.nbytes
        call = pl.pallas_call(
            kernel,
            out_shape=jax.ShapeDtypeStruct((M, DL), out_dtype),
            grid=(M // tm,),
            in_specs=in_specs,
            out_specs=pl.BlockSpec((tm, DL), lambda i: (i, 0)),
            compiler_params=pltpu.CompilerParams(
                dimension_semantics=("parallel",),
                vmem_limit_bytes=_FUSED_VMEM_LIMIT),
            cost_estimate=pl.CostEstimate(flops=int(flops), transcendentals=0,
                                          bytes_accessed=int(bytes_acc)),
        )
        return call, args

    try:
        call, args = build(True)
        return call(*args)
    except Exception:
        # Fallback: default double-buffered weight blocks.
        call, args = build(False)
        return call(*args)


# ----------------------------------------------------------------------------
# Kernel 2: tiled single-layer linear (+ optional bias / skip / ReLU)
# ----------------------------------------------------------------------------
def _tiled_linear_kernel(*refs, apply_act, add_bias, add_skip):
    x_ref = refs[0]
    w_ref = refs[1]
    pos = 2
    b_ref = s_ref = None
    if add_bias:
        b_ref = refs[pos]
        pos += 1
    if add_skip:
        s_ref = refs[pos]
        pos += 1
    o_ref = refs[pos]
    acc_ref = refs[pos + 1]

    @pl.when(pl.program_id(2) == 0)
    def _init():
        acc_ref[...] = jnp.zeros_like(acc_ref)

    acc_ref[...] += jnp.dot(x_ref[...].astype(jnp.bfloat16), w_ref[...],
                            preferred_element_type=jnp.float32)

    @pl.when(pl.program_id(2) == pl.num_programs(2) - 1)
    def _finalize():
        y = acc_ref[...]
        if add_bias:
            y = y + b_ref[...]
        if add_skip:
            y = y + s_ref[...].astype(jnp.float32)      # skip-add before activation
        if apply_act:
            y = jnp.maximum(y, 0.0)
        o_ref[...] = y.astype(o_ref.dtype)


def pallas_linear_tiled(x, w, b=None, skip=None, *, apply_act, out_dtype):
    """x: [M, K] (bf16 or f32, padded), w: [K, N] bf16 (padded), b: [1, N] f32."""
    M, K = x.shape
    K2, N = w.shape
    assert K == K2
    tm = _pick_tile(M, _TM_CAP_TILED, 8)
    tk = _pick_tile(K, _TF_CAP, 128)
    tn = _pick_tile(N, _TF_CAP, 128)

    add_bias = b is not None
    add_skip = skip is not None
    out_isize = jnp.dtype(out_dtype).itemsize

    def working_set(tm_, tk_, tn_):
        s = 2 * tm_ * tk_ * x.dtype.itemsize + 2 * tk_ * tn_ * w.dtype.itemsize
        s += tm_ * tn_ * 4                              # f32 accumulator scratch
        s += 2 * tm_ * tn_ * out_isize                  # output blocks
        if add_bias:
            s += 2 * tn_ * 4
        if add_skip:
            s += 2 * tm_ * tn_ * skip.dtype.itemsize
        return s

    budget = _TILED_VMEM_LIMIT - 4 * _MiB
    while working_set(tm, tk, tn) > budget:
        if tm > 8:
            tm = _pick_tile(M, max(8, tm // 2), 8)
        elif tk > 128:
            tk = _pick_tile(K, max(128, tk // 2), 128)
        elif tn > 128:
            tn = _pick_tile(N, max(128, tn // 2), 128)
        else:
            break
    assert M % tm == 0 and K % tk == 0 and N % tn == 0

    args = [x, w]
    in_specs = [
        pl.BlockSpec((tm, tk), lambda i, j, k: (i, k)),
        pl.BlockSpec((tk, tn), lambda i, j, k: (k, j)),
    ]
    # Real re-streamed HBM traffic: X is read once per N tile, W once per M tile.
    bytes_acc = ((N // tn) * M * K * x.dtype.itemsize
                 + (M // tm) * K * N * w.dtype.itemsize
                 + M * N * out_isize)
    if add_bias:
        args.append(b)
        in_specs.append(pl.BlockSpec((1, tn), lambda i, j, k: (0, j)))
        bytes_acc += (M // tm) * N * b.dtype.itemsize
    if add_skip:
        args.append(skip)
        in_specs.append(pl.BlockSpec((tm, tn), lambda i, j, k: (i, j)))
        bytes_acc += M * N * skip.dtype.itemsize

    kernel = functools.partial(_tiled_linear_kernel, apply_act=apply_act,
                               add_bias=add_bias, add_skip=add_skip)
    return pl.pallas_call(
        kernel,
        out_shape=jax.ShapeDtypeStruct((M, N), out_dtype),
        grid=(M // tm, N // tn, K // tk),
        in_specs=in_specs,
        out_specs=pl.BlockSpec((tm, tn), lambda i, j, k: (i, j)),
        scratch_shapes=[pltpu.VMEM((tm, tn), jnp.float32)],
        compiler_params=pltpu.CompilerParams(
            dimension_semantics=("parallel", "parallel", "arbitrary"),
            vmem_limit_bytes=_TILED_VMEM_LIMIT),
        cost_estimate=pl.CostEstimate(flops=2 * M * K * N, transcendentals=0,
                                      bytes_accessed=int(bytes_acc)),
    )(*args)


# ----------------------------------------------------------------------------
# Module port
# ----------------------------------------------------------------------------
class MLP:
    """JAX/Pallas port of the PyTorch MLP module (forward pass)."""

    def __init__(self, input_size, hidden_layer_size, output_size,
                 activation="relu", bias=True, skip_connections=False,
                 key=None, force_tiled=False):
        assert isinstance(input_size, (int, list))
        assert hidden_layer_size is None or isinstance(hidden_layer_size, (int, list))
        assert isinstance(output_size, (int, list))
        if isinstance(input_size, int):
            input_size = [input_size]
        if hidden_layer_size is None:
            hidden_layer_size = []
        elif isinstance(hidden_layer_size, int):
            hidden_layer_size = [hidden_layer_size]
        if isinstance(output_size, int):
            output_size = [output_size]

        self.input_size = input_size
        self.hidden_layer_size = hidden_layer_size
        self.output_size = output_size
        self.bias = bias
        self.skip_connections = skip_connections
        self.force_tiled = force_tiled
        assert activation == "relu"   # F.relu default; fused in-kernel

        if skip_connections:
            dims = [sum(input_size)] + list(hidden_layer_size) + [sum(output_size)]
            assert all(d == dims[0] for d in dims), \
                "skip_connections requires equal layer widths"

        if key is None:
            key = jax.random.PRNGKey(0)

        # torch.nn.Linear-style init (uniform in +-1/sqrt(fan_in)).
        # Weights stored pre-padded & transposed ([Din, Dout]) in bf16,
        # biases pre-padded in f32.
        self.layer_dims = []   # logical (Din, Dout)
        self.params = []       # padded (w_pad, b_pad | None)
        prev = sum(input_size)
        sizes = list(hidden_layer_size) + [sum(output_size)]
        for size in sizes:
            key, kw, kb = jax.random.split(key, 3)
            bound = 1.0 / float(prev) ** 0.5
            w = jax.random.uniform(kw, (prev, size), dtype=jnp.float32,
                                   minval=-bound, maxval=bound)
            din_p = _pad_feature(prev)
            dout_p = _pad_feature(size)
            w_pad = jnp.pad(w.astype(jnp.bfloat16),
                            ((0, din_p - prev), (0, dout_p - size)))
            if bias:
                b = jax.random.uniform(kb, (1, size), dtype=jnp.float32,
                                       minval=-bound, maxval=bound)
                b_pad = jnp.pad(b, ((0, 0), (0, dout_p - size)))
            else:
                b_pad = None
            self.layer_dims.append((prev, size))
            self.params.append((w_pad, b_pad))
            prev = size

    # ---- path selection -----------------------------------------------------
    def _fused_vmem_estimate(self, tm, d0_pad):
        total = 2 * tm * d0_pad * 2                      # x blocks (bf16, dbl-buffered)
        max_pad = d0_pad
        for w_p, b_p in self.params:
            total += 2 * w_p.size * 2                    # bf16 weights (worst case 2 bufs)
            if b_p is not None:
                total += 2 * b_p.size * 4
            max_pad = max(max_pad, w_p.shape[1])
        dl_pad = self.params[-1][0].shape[1]
        total += 2 * tm * dl_pad * 4                     # output blocks (f32)
        total += 4 * tm * max_pad * 4                    # live intermediates headroom
        return total

    def _use_fused(self, tm, d0_pad):
        if self.force_tiled:
            return False
        return self._fused_vmem_estimate(tm, d0_pad) <= _FUSED_MAX_BYTES

    # ---- forward ------------------------------------------------------------
    def __call__(self, *inputs):
        if len(inputs) == 1:
            x = inputs[0]
        else:
            x = jnp.concatenate(inputs, axis=-1)

        lead_shape = x.shape[:-1]
        feat = x.shape[-1]
        assert feat == sum(self.input_size)

        x2 = x.reshape((-1, feat)).astype(jnp.bfloat16)
        b_logical = x2.shape[0]
        b_pad = _pad_batch(b_logical)
        f_pad = _pad_feature(feat)
        x_pad = jnp.pad(x2, ((0, b_pad - b_logical), (0, f_pad - feat)))

        tm_est = _pick_tile(b_pad, _TM_CAP_FUSED, 8)
        if self._use_fused(tm_est, f_pad):
            y = pallas_mlp_fused(x_pad, self.params,
                                 use_bias=self.bias,
                                 skip_connections=self.skip_connections,
                                 out_dtype=jnp.float32)
        else:
            h = x_pad
            n = len(self.params)
            # Keep the residual stream in f32 when skip_connections (matches
            # reference numerics); otherwise bf16 halves activation HBM traffic.
            inter_dtype = jnp.float32 if self.skip_connections else jnp.bfloat16
            for li, (w_p, b_p) in enumerate(self.params):
                is_last = li == n - 1
                x_in = h
                h = pallas_linear_tiled(
                    x_in, w_p, b_p,
                    skip=x_in if self.skip_connections else None,
                    apply_act=not is_last,
                    out_dtype=jnp.float32 if is_last else inter_dtype)
            y = h

        dout_logical = self.layer_dims[-1][1]
        y = y[:b_logical, :dout_logical].reshape(lead_shape + (dout_logical,))

        if len(self.output_size) == 1:
            return y
        outputs, index = [], 0
        for size in self.output_size:
            outputs.append(y[..., index:index + size])
            index += size
        return outputs


# ----------------------------------------------------------------------------
# Pure-JAX reference (mirrors the kernels' bf16-in / f32-accumulate precision)
# ----------------------------------------------------------------------------
def _reference_forward(mlp, *inputs):
    if len(inputs) == 1:
        x = inputs[0]
    else:
        x = jnp.concatenate(inputs, axis=-1)
    # The kernels quantize the input once to bf16 at the boundary.
    h = x.astype(jnp.bfloat16).astype(jnp.float32)
    n = len(mlp.params)
    for li, ((din, dout), (w_p, b_p)) in enumerate(zip(mlp.layer_dims, mlp.params)):
        w = w_p[:din, :dout].astype(jnp.float32)
        hq = h.astype(jnp.bfloat16).astype(jnp.float32)
        y = hq @ w
        if b_p is not None:
            y = y + b_p[0, :dout]
        if mlp.skip_connections:
            y = y + h
        if li != n - 1:
            y = jnp.maximum(y, 0.0)
        h = y
    if len(mlp.output_size) == 1:
        return h
    outs, idx = [], 0
    for s in mlp.output_size:
        outs.append(h[..., idx:idx + s])
        idx += s
    return outs


def _as_list(x):
    return x if isinstance(x, list) else [x]


if __name__ == "__main__":
    key = jax.random.PRNGKey(0)
    k_in1, k_in2, k_params, k_skip = jax.random.split(key, 4)

    batch = 8
    x1 = jax.random.normal(k_in1, (batch, 16), dtype=jnp.float32)
    x2 = jax.random.normal(k_in2, (batch, 16), dtype=jnp.float32)

    # 1) fused path: two concatenated inputs, hidden layers, split outputs.
    mlp = MLP(input_size=[16, 16], hidden_layer_size=[64, 32],
              output_size=[24, 8], bias=True, skip_connections=False,
              key=k_params)
    outs = _as_list(mlp(x1, x2))
    outs = [jax.block_until_ready(o) for o in outs]
    refs = _as_list(_reference_forward(mlp, x1, x2))
    for o, r in zip(outs, refs):
        assert o.shape == r.shape
        assert jnp.allclose(o, r, atol=1e-2, rtol=1e-2)

    # 2) tiled fallback path exercised on the same small problem.
    mlp_tiled = MLP(input_size=[16, 16], hidden_layer_size=[64, 32],
                    output_size=[24, 8], bias=True, skip_connections=False,
                    key=k_params, force_tiled=True)
    outs_t = _as_list(mlp_tiled(x1, x2))
    outs_t = [jax.block_until_ready(o) for o in outs_t]
    for o, r in zip(outs_t, refs):
        assert o.shape == r.shape
        assert jnp.allclose(o, r, atol=2e-2, rtol=2e-2)

    # 3) skip_connections path (relu applied AFTER the skip-add, in-kernel).
    mlp_skip = MLP(input_size=32, hidden_layer_size=[32, 32], output_size=32,
                   bias=True, skip_connections=True, key=k_skip)
    xs = jax.random.normal(k_in1, (batch, 32), dtype=jnp.float32)
    o_skip = jax.block_until_ready(mlp_skip(xs))
    r_skip = _reference_forward(mlp_skip, xs)
    assert o_skip.shape == r_skip.shape
    assert jnp.allclose(o_skip, r_skip, atol=1e-2, rtol=1e-2)

    # 4) skip_connections through the tiled path (f32 residual stream).
    mlp_skip_t = MLP(input_size=32, hidden_layer_size=[32, 32], output_size=32,
                     bias=True, skip_connections=True, key=k_skip,
                     force_tiled=True)
    o_skip_t = jax.block_until_ready(mlp_skip_t(xs))
    assert jnp.allclose(o_skip_t, r_skip, atol=1e-2, rtol=1e-2)

    print("KERNEL_OK")
</pallas_src>

<mosaic_0001>
module attributes {stable_mosaic.version = 11 : i64} {
  func.func @_fused_mlp_kernel(%arg0: i32, %arg1: memref<8x128xbf16, #tpu.memory_space<vmem>>, %arg2: memref<128x128xbf16, #tpu.memory_space<vmem>>, %arg3: memref<1x128xf32, #tpu.memory_space<vmem>>, %arg4: memref<128x128xbf16, #tpu.memory_space<vmem>>, %arg5: memref<1x128xf32, #tpu.memory_space<vmem>>, %arg6: memref<128x128xbf16, #tpu.memory_space<vmem>>, %arg7: memref<1x128xf32, #tpu.memory_space<vmem>>, %arg8: memref<8x128xf32, #tpu.memory_space<vmem>>) attributes {dimension_semantics = [#tpu.dimension_semantics<parallel>], iteration_bounds = array<i64: 1>, scalar_prefetch = 0 : i64, scratch_operands = 0 : i64, tpu.core_type = #tpu.core_type<tc>, window_params = [{transform_indices = @transform_0, window_bounds = array<i64: 8, 128>}, {pipeline_mode = #tpu.pipeline_mode<synchronous>, transform_indices = @transform_1, window_bounds = array<i64: 128, 128>}, {pipeline_mode = #tpu.pipeline_mode<synchronous>, transform_indices = @transform_2, window_bounds = array<i64: 1, 128>}, {pipeline_mode = #tpu.pipeline_mode<synchronous>, transform_indices = @transform_3, window_bounds = array<i64: 128, 128>}, {pipeline_mode = #tpu.pipeline_mode<synchronous>, transform_indices = @transform_4, window_bounds = array<i64: 1, 128>}, {pipeline_mode = #tpu.pipeline_mode<synchronous>, transform_indices = @transform_5, window_bounds = array<i64: 128, 128>}, {pipeline_mode = #tpu.pipeline_mode<synchronous>, transform_indices = @transform_6, window_bounds = array<i64: 1, 128>}, {transform_indices = @transform_7, window_bounds = array<i64: 8, 128>}]} {
    %c0 = arith.constant 0 : index
    %c0_0 = arith.constant 0 : index
    %0 = vector.load %arg1[%c0, %c0_0] : memref<8x128xbf16, #tpu.memory_space<vmem>>, vector<8x128xbf16>
    %c0_1 = arith.constant 0 : index
    %c0_2 = arith.constant 0 : index
    %1 = vector.load %arg2[%c0_1, %c0_2] : memref<128x128xbf16, #tpu.memory_space<vmem>>, vector<128x128xbf16>
    %cst = arith.constant dense<0.000000e+00> : vector<8x128xf32>
    %2 = tpu.matmul %0, %1, %cst {dimension_numbers = #tpu.dot_dimension_numbers<[1], [0], [0], [1], [0, 0, 1, 1], [], []>} : vector<8x128xbf16>, vector<128x128xbf16>, vector<8x128xf32> -> vector<8x128xf32>
    %c0_3 = arith.constant 0 : index
    %c0_4 = arith.constant 0 : index
    %3 = vector.load %arg3[%c0_3, %c0_4] : memref<1x128xf32, #tpu.memory_space<vmem>>, vector<1x128xf32>
    %4 = vector.broadcast %3 : vector<1x128xf32> to vector<8x128xf32>
    %5 = arith.addf %2, %4 : vector<8x128xf32>
    %cst_5 = arith.constant 0.000000e+00 : f32
    %6 = vector.broadcast %cst_5 : f32 to vector<8x128xf32>
    %7 = arith.maximumf %5, %6 : vector<8x128xf32>
    %8 = arith.truncf %7 : vector<8x128xf32> to vector<8x128xbf16>
    %c0_6 = arith.constant 0 : index
    %c0_7 = arith.constant 0 : index
    %9 = vector.load %arg4[%c0_6, %c0_7] : memref<128x128xbf16, #tpu.memory_space<vmem>>, vector<128x128xbf16>
    %cst_8 = arith.constant dense<0.000000e+00> : vector<8x128xf32>
    %10 = tpu.matmul %8, %9, %cst_8 {dimension_numbers = #tpu.dot_dimension_numbers<[1], [0], [0], [1], [0, 0, 1, 1], [], []>} : vector<8x128xbf16>, vector<128x128xbf16>, vector<8x128xf32> -> vector<8x128xf32>
    %c0_9 = arith.constant 0 : index
    %c0_10 = arith.constant 0 : index
    %11 = vector.load %arg5[%c0_9, %c0_10] : memref<1x128xf32, #tpu.memory_space<vmem>>, vector<1x128xf32>
    %12 = vector.broadcast %11 : vector<1x128xf32> to vector<8x128xf32>
    %13 = arith.addf %10, %12 : vector<8x128xf32>
    %cst_11 = arith.constant 0.000000e+00 : f32
    %14 = vector.broadcast %cst_11 : f32 to vector<8x128xf32>
    %15 = arith.maximumf %13, %14 : vector<8x128xf32>
    %16 = arith.truncf %15 : vector<8x128xf32> to vector<8x128xbf16>
    %c0_12 = arith.constant 0 : index
    %c0_13 = arith.constant 0 : index
    %17 = vector.load %arg6[%c0_12, %c0_13] : memref<128x128xbf16, #tpu.memory_space<vmem>>, vector<128x128xbf16>
    %cst_14 = arith.constant dense<0.000000e+00> : vector<8x128xf32>
    %18 = tpu.matmul %16, %17, %cst_14 {dimension_numbers = #tpu.dot_dimension_numbers<[1], [0], [0], [1], [0, 0, 1, 1], [], []>} : vector<8x128xbf16>, vector<128x128xbf16>, vector<8x128xf32> -> vector<8x128xf32>
    %c0_15 = arith.constant 0 : index
    %c0_16 = arith.constant 0 : index
    %19 = vector.load %arg7[%c0_15, %c0_16] : memref<1x128xf32, #tpu.memory_space<vmem>>, vector<1x128xf32>
    %20 = vector.broadcast %19 : vector<1x128xf32> to vector<8x128xf32>
    %21 = arith.addf %18, %20 : vector<8x128xf32>
    %c0_17 = arith.constant 0 : index
    %c0_18 = arith.constant 0 : index
    %22 = vector.load %arg8[%c0_17, %c0_18] : memref<8x128xf32, #tpu.memory_space<vmem>>, vector<8x128xf32>
    tpu.vector_store %arg8[%c0_17, %c0_18], %21 {strides = array<i32>} : memref<8x128xf32, #tpu.memory_space<vmem>>, vector<8x128xf32>,
    return
  }
  func.func @transform_0(%arg0: i32) -> (i32, i32) {
    %c0_i32 = arith.constant 0 : i32
    %c0_i32_0 = arith.constant 0 : i32
    return %arg0, %c0_i32 : i32, i32
  }
  func.func @transform_1(%arg0: i32) -> (i32, i32) {
    %c0_i32 = arith.constant 0 : i32
    %c0_i32_0 = arith.constant 0 : i32
    %c0_i32_1 = arith.constant 0 : i32
    return %c0_i32, %c0_i32_0 : i32, i32
  }
  func.func @transform_2(%arg0: i32) -> (i32, i32) {
    %c0_i32 = arith.constant 0 : i32
    %c0_i32_0 = arith.constant 0 : i32
    %c0_i32_1 = arith.constant 0 : i32
    return %c0_i32, %c0_i32_0 : i32, i32
  }
  func.func @transform_3(%arg0: i32) -> (i32, i32) {
    %c0_i32 = arith.constant 0 : i32
    %c0_i32_0 = arith.constant 0 : i32
    %c0_i32_1 = arith.constant 0 : i32
    return %c0_i32, %c0_i32_0 : i32, i32
  }
  func.func @transform_4(%arg0: i32) -> (i32, i32) {
    %c0_i32 = arith.constant 0 : i32
    %c0_i32_0 = arith.constant 0 : i32
    %c0_i32_1 = arith.constant 0 : i32
    return %c0_i32, %c0_i32_0 : i32, i32
  }
  func.func @transform_5(%arg0: i32) -> (i32, i32) {
    %c0_i32 = arith.constant 0 : i32
    %c0_i32_0 = arith.constant 0 : i32
    %c0_i32_1 = arith.constant 0 : i32
    return %c0_i32, %c0_i32_0 : i32, i32
  }
  func.func @transform_6(%arg0: i32) -> (i32, i32) {
    %c0_i32 = arith.constant 0 : i32
    %c0_i32_0 = arith.constant 0 : i32
    %c0_i32_1 = arith.constant 0 : i32
    return %c0_i32, %c0_i32_0 : i32, i32
  }
  func.func @transform_7(%arg0: i32) -> (i32, i32) {
    %c0_i32 = arith.constant 0 : i32
    %c0_i32_0 = arith.constant 0 : i32
    return %arg0, %c0_i32 : i32, i32
  }
}

module attributes {stable_mosaic.version = 11 : i64} {
  func.func @_fused_mlp_kernel(%arg0: i32, %arg1: memref<8x128xbf16, #tpu.memory_space<vmem>>, %arg2: memref<128x128xbf16, #tpu.memory_space<vmem>>, %arg3: memref<1x128xf32, #tpu.memory_space<vmem>>, %arg4: memref<128x128xbf16, #tpu.memory_space<vmem>>, %arg5: memref<1x128xf32, #tpu.memory_space<vmem>>, %arg6: memref<128x128xbf16, #tpu.memory_space<vmem>>, %arg7: memref<1x128xf32, #tpu.memory_space<vmem>>, %arg8: memref<8x128xf32, #tpu.memory_space<vmem>>) attributes {dimension_semantics = [#tpu.dimension_semantics<parallel>], iteration_bounds = array<i64: 1>, scalar_prefetch = 0 : i64, scratch_operands = 0 : i64, tpu.core_type = #tpu.core_type<tc>, window_params = [{transform_indices = @transform_0, window_bounds = array<i64: 8, 128>}, {pipeline_mode = #tpu.pipeline_mode<synchronous>, transform_indices = @transform_1, window_bounds = array<i64: 128, 128>}, {pipeline_mode = #tpu.pipeline_mode<synchronous>, transform_indices = @transform_2, window_bounds = array<i64: 1, 128>}, {pipeline_mode = #tpu.pipeline_mode<synchronous>, transform_indices = @transform_3, window_bounds = array<i64: 128, 128>}, {pipeline_mode = #tpu.pipeline_mode<synchronous>, transform_indices = @transform_4, window_bounds = array<i64: 1, 128>}, {pipeline_mode = #tpu.pipeline_mode<synchronous>, transform_indices = @transform_5, window_bounds = array<i64: 128, 128>}, {pipeline_mode = #tpu.pipeline_mode<synchronous>, transform_indices = @transform_6, window_bounds = array<i64: 1, 128>}, {transform_indices = @transform_7, window_bounds = array<i64: 8, 128>}]} {
    %c0 = arith.constant 0 : index
    %c0_0 = arith.constant 0 : index
    %0 = vector.load %arg1[%c0, %c0_0] : memref<8x128xbf16, #tpu.memory_space<vmem>>, vector<8x128xbf16>
    %c0_1 = arith.constant 0 : index
    %c0_2 = arith.constant 0 : index
    %1 = vector.load %arg2[%c0_1, %c0_2] : memref<128x128xbf16, #tpu.memory_space<vmem>>, vector<128x128xbf16>
    %cst = arith.constant dense<0.000000e+00> : vector<8x128xf32>
    %2 = tpu.matmul %0, %1, %cst {dimension_numbers = #tpu.dot_dimension_numbers<[1], [0], [0], [1], [0, 0, 1, 1], [], []>} : vector<8x128xbf16>, vector<128x128xbf16>, vector<8x128xf32> -> vector<8x128xf32>
    %c0_3 = arith.constant 0 : index
    %c0_4 = arith.constant 0 : index
    %3 = vector.load %arg3[%c0_3, %c0_4] : memref<1x128xf32, #tpu.memory_space<vmem>>, vector<1x128xf32>
    %4 = vector.broadcast %3 : vector<1x128xf32> to vector<8x128xf32>
    %5 = arith.addf %2, %4 : vector<8x128xf32>
    %cst_5 = arith.constant 0.000000e+00 : f32
    %6 = vector.broadcast %cst_5 : f32 to vector<8x128xf32>
    %7 = arith.maximumf %5, %6 : vector<8x128xf32>
    %8 = arith.truncf %7 : vector<8x128xf32> to vector<8x128xbf16>
    %c0_6 = arith.constant 0 : index
    %c0_7 = arith.constant 0 : index
    %9 = vector.load %arg4[%c0_6, %c0_7] : memref<128x128xbf16, #tpu.memory_space<vmem>>, vector<128x128xbf16>
    %cst_8 = arith.constant dense<0.000000e+00> : vector<8x128xf32>
    %10 = tpu.matmul %8, %9, %cst_8 {dimension_numbers = #tpu.dot_dimension_numbers<[1], [0], [0], [1], [0, 0, 1, 1], [], []>} : vector<8x128xbf16>, vector<128x128xbf16>, vector<8x128xf32> -> vector<8x128xf32>
    %c0_9 = arith.constant 0 : index
    %c0_10 = arith.constant 0 : index
    %11 = vector.load %arg5[%c0_9, %c0_10] : memref<1x128xf32, #tpu.memory_space<vmem>>, vector<1x128xf32>
    %12 = vector.broadcast %11 : vector<1x128xf32> to vector<8x128xf32>
    %13 = arith.addf %10, %12 : vector<8x128xf32>
    %cst_11 = arith.constant 0.000000e+00 : f32
    %14 = vector.broadcast %cst_11 : f32 to vector<8x128xf32>
    %15 = arith.maximumf %13, %14 : vector<8x128xf32>
    %16 = arith.truncf %15 : vector<8x128xf32> to vector<8x128xbf16>
    %c0_12 = arith.constant 0 : index
    %c0_13 = arith.constant 0 : index
    %17 = vector.load %arg6[%c0_12, %c0_13] : memref<128x128xbf16, #tpu.memory_space<vmem>>, vector<128x128xbf16>
    %cst_14 = arith.constant dense<0.000000e+00> : vector<8x128xf32>
    %18 = tpu.matmul %16, %17, %cst_14 {dimension_numbers = #tpu.dot_dimension_numbers<[1], [0], [0], [1], [0, 0, 1, 1], [], []>} : vector<8x128xbf16>, vector<128x128xbf16>, vector<8x128xf32> -> vector<8x128xf32>
    %c0_15 = arith.constant 0 : index
    %c0_16 = arith.constant 0 : index
    %19 = vector.load %arg7[%c0_15, %c0_16] : memref<1x128xf32, #tpu.memory_space<vmem>>, vector<1x128xf32>
    %20 = vector.broadcast %19 : vector<1x128xf32> to vector<8x128xf32>
    %21 = arith.addf %18, %20 : vector<8x128xf32>
    %c0_17 = arith.constant 0 : index
    %c0_18 = arith.constant 0 : index
    %22 = vector.load %arg8[%c0_17, %c0_18] : memref<8x128xf32, #tpu.memory_space<vmem>>, vector<8x128xf32>
    tpu.vector_store %arg8[%c0_17, %c0_18], %21 {strides = array<i32>} : memref<8x128xf32, #tpu.memory_space<vmem>>, vector<8x128xf32>,
    return
  }
  func.func @transform_0(%arg0: i32) -> (i32, i32) {
    %c0_i32 = arith.constant 0 : i32
    %c0_i32_0 = arith.constant 0 : i32
    return %arg0, %c0_i32 : i32, i32
  }
  func.func @transform_1(%arg0: i32) -> (i32, i32) {
    %c0_i32 = arith.constant 0 : i32
    %c0_i32_0 = arith.constant 0 : i32
    %c0_i32_1 = arith.constant 0 : i32
    return %c0_i32, %c0_i32_0 : i32, i32
  }
  func.func @transform_2(%arg0: i32) -> (i32, i32) {
    %c0_i32 = arith.constant 0 : i32
    %c0_i32_0 = arith.constant 0 : i32
    %c0_i32_1 = arith.constant 0 : i32
    return %c0_i32, %c0_i32_0 : i32, i32
  }
  func.func @transform_3(%arg0: i32) -> (i32, i32) {
    %c0_i32 = arith.constant 0 : i32
    %c0_i32_0 = arith.constant 0 : i32
    %c0_i32_1 = arith.constant 0 : i32
    return %c0_i32, %c0_i32_0 : i32, i32
  }
  func.func @transform_4(%arg0: i32) -> (i32, i32) {
    %c0_i32 = arith.constant 0 : i32
    %c0_i32_0 = arith.constant 0 : i32
    %c0_i32_1 = arith.constant 0 : i32
    return %c0_i32, %c0_i32_0 : i32, i32
  }
  func.func @transform_5(%arg0: i32) -> (i32, i32) {
    %c0_i32 = arith.constant 0 : i32
    %c0_i32_0 = arith.constant 0 : i32
    %c0_i32_1 = arith.constant 0 : i32
    return %c0_i32, %c0_i32_0 : i32, i32
  }
  func.func @transform_6(%arg0: i32) -> (i32, i32) {
    %c0_i32 = arith.constant 0 : i32
    %c0_i32_0 = arith.constant 0 : i32
    %c0_i32_1 = arith.constant 0 : i32
    return %c0_i32, %c0_i32_0 : i32, i32
  }
  func.func @transform_7(%arg0: i32) -> (i32, i32) {
    %c0_i32 = arith.constant 0 : i32
    %c0_i32_0 = arith.constant 0 : i32
    return %arg0, %c0_i32 : i32, i32
  }
}

</mosaic_0001>

<bundles_post_ra>
// kernel: tpu_custom_call.1
= control target key start
LH: loop header
LB: loop body
LE: loop exit
PB: predicated region body
PF: predicated region fallthrough
CT: control target
= control target key end

     0   :  { %12 = vsyncpa [#allocation3], 0  ;;  %s804_s0 = inlined_call_operand.hbm [shape: bf16[8,128], index: 0, kind: input, shape index: {}]   ;;  %s805_s1 = inlined_call_operand.hbm [shape: bf16[128,128], index: 1, kind: input, shape index: {}]   ;;  %s806_s2 = inlined_call_operand.vmem [shape: f32[1,128], index: 2, kind: input, shape index: {}]   ;;  %s807_s3 = inlined_call_operand.hbm [shape: bf16[128,128], index: 3, kind: input, shape index: {}]   ;;  %s808_s4 = inlined_call_operand.vmem [shape: f32[1,128], index: 4, kind: input, shape index: {}]   ;;  %s809_s5 = inlined_call_operand.hbm [shape: bf16[128,128], index: 5, kind: input, shape index: {}]   ;;  %s810_s6 = inlined_call_operand.vmem [shape: f32[1,128], index: 6, kind: input, shape index: {}]   ;;  %s811_s7 = inlined_call_operand.hbm [shape: f32[8,128], index: 7, kind: output, shape index: {}]  }
   0x1   :  { %13 = vsyncpa [#allocation6], 0 }
   0x2   :  { %14 = vsyncpa [#allocation9], 0 }
   0x3   :  { %15 = vsyncpa [#allocation4], 0  ;;  %s692_s24 = smov [#allocation5]  }
   0x4   :  { %s31_s25 = sshll.u32 %s692_s24, 4  ;;  %s32_s25 = int_to_ptr.vmem [resolvable:$true] %s31_s25 }
   0x5   :  { %s592_s26 = scalar_lea.vmem %s32_s25, 1024  ;;  %p597_p1 = scmp.lt.s32.totalorder %s32_s25, %s32_s25 }
   0x6   :  { %p593_p0 = scmp.ne.s32.totalorder %s32_s25, %s592_s26  ;;  %p598_p2 = scmp.lt.s32.totalorder %s592_s26, %s592_s26 }
   0x8   :  { %p599_p3 = por %p598_p2, %p597_p1 }
   0xa   :  { %p600_p4 = pnand %p599_p3, %p593_p0 }
   0xc   :  { %603 = shalt.err (!%p600_p4)
}
   0xd   :  { %s693_s27 = smov 64   ;;  %s694_s28 = smov 4  }
   0xe   :  { %37 = dma.hbm_to_vmem [thread:$0]  %s805_s1, 1024, %s32_s25, [#allocation6], %s693_s27, %s693_s27, %s694_s28  }
   0xf   :  { %s695_s8 = smov [#allocation2]   ;;  %s696_s10 = smov [#allocation7]  }
  0x10   :  { %s22_s9 = sshll.u32 %s695_s8, 4  ;;  %s45_s11 = sshll.u32 %s696_s10, 4  ;;  %s23_s9 = int_to_ptr.vmem [resolvable:$true] %s22_s9  ;;  %s46_s11 = int_to_ptr.vmem [resolvable:$true] %s45_s11 }
  0x11   :  { %s612_s12 = scalar_lea.vmem %s23_s9, 64  ;;  %p617_p6 = scmp.lt.s32.totalorder %s23_s9, %s23_s9 }
  0x12   :  { %p613_p5 = scmp.ne.s32.totalorder %s23_s9, %s612_s12  ;;  %p618_p7 = scmp.lt.s32.totalorder %s612_s12, %s612_s12 }
  0x14   :  { %p619_p8 = por %p618_p7, %p617_p6 }
  0x16   :  { %p620_p9 = pnand %p619_p8, %p613_p5 }
  0x18   :  { %623 = shalt.err (!%p620_p9)
}
  0x19   :  { %25 = dma.hbm_to_vmem [thread:$0]  %s804_s0, 64, %s23_s9, [#allocation3]  }
  0x1a   :  { %s632_s15 = scalar_lea.vmem %s46_s11, 1024  ;;  %p637_p11 = scmp.lt.s32.totalorder %s46_s11, %s46_s11 }
  0x1b   :  { %p633_p10 = scmp.ne.s32.totalorder %s46_s11, %s632_s15  ;;  %p638_p12 = scmp.lt.s32.totalorder %s632_s15, %s632_s15 }
  0x1d   :  { %p639_p13 = por %p638_p12, %p637_p11 }
  0x1f   :  { %p640_p0 = pnand %p639_p13, %p633_p10 }
  0x21   :  { %643 = shalt.err (!%p640_p0)
}
  0x22   :  { %51 = dma.hbm_to_vmem [thread:$0]  %s807_s3, 1024, %s46_s11, [#allocation6], %s693_s27, %s693_s27, %s694_s28  }
  0x23   :  { %s697_s17 = smov [#allocation8]  }
  0x24   :  { %s59_s18 = sshll.u32 %s697_s17, 4  ;;  %s60_s18 = int_to_ptr.vmem [resolvable:$true] %s59_s18 }
  0x25   :  { %s652_s19 = scalar_lea.vmem %s60_s18, 1024  ;;  %p657_p2 = scmp.lt.s32.totalorder %s60_s18, %s60_s18 }
  0x26   :  { %p653_p1 = scmp.ne.s32.totalorder %s60_s18, %s652_s19  ;;  %p658_p3 = scmp.lt.s32.totalorder %s652_s19, %s652_s19 }
  0x28   :  { %p659_p4 = por %p658_p3, %p657_p2 }
  0x2a   :  { %p660_p5 = pnand %p659_p4, %p653_p1 }
  0x2c   :  { %663 = shalt.err (!%p660_p5)
}
  0x2d   :  { %65 = dma.hbm_to_vmem [thread:$0]  %s809_s5, 1024, %s60_s18, [#allocation9], %s693_s27, %s693_s27, %s694_s28  }
  0x2e   :  { %684 = dma.done.wait [#allocation3], 64  }
  0x2f   :  { %685 = vsyncadd [#allocation3], 4294967232 }
  0x30   :  { %686 = dma.done.wait [#allocation6], 2048  }
  0x31   :  { %687 = vsyncadd [#allocation6], 4294965248 }
  0x32   :  { %688 = dma.done.wait [#allocation9], 1024  }
  0x33   :  { %689 = vsyncadd [#allocation9], 4294966272  ;;  %v698_v0 = vmov 0.0   ;;  %vm699_vm0 = vmmov 0   ;;  %v560_v1 = vld [vmem:[#allocation5 + $0x38] sm:$0xff]   ;;  %v561_v2 = vld [vmem:[#allocation5 + $0x30] sm:$0xff]  }
  0x34   :  { %491 = vmatprep.subr.bf16.mxu0 %v698_v0  ;;  %507 = vmatprep.mubr.msk.bf16.mxu0 %vm699_vm0, %v698_v0  ;;  %v562_v3 = vld [vmem:[#allocation5 + $0x28] sm:$0xff]   ;;  %v568_v4 = vld [vmem:[#allocation7 + $0x38] sm:$0xff]   ;;  %v563_v5 = vld [vmem:[#allocation5 + $0x20] sm:$0xff]   ;;  %s700_s24 = smov [#allocation10]  }
  0x35   :  { %511 = vmatprep.subr.bf16.mxu1 %v698_v0  ;;  %527 = vmatprep.mubr.msk.bf16.mxu1 %vm699_vm0, %v698_v0  ;;  %v569_v6 = vld [vmem:[#allocation7 + $0x30] sm:$0xff]   ;;  %v564_v7 = vld [vmem:[#allocation5 + $0x18] sm:$0xff]   ;;  %v570_v8 = vld [vmem:[#allocation7 + $0x28] sm:$0xff]   ;;  %s426_s25 = sshll.u32 %s700_s24, 4  ;;  %s427_s25 = int_to_ptr.vmem [resolvable:$true] %s426_s25 }
  0x36   :  { %492 = vmatpush3.bf16.msra.mxu0 %v560_v1  ;;  %512 = vmatpush3.bf16.msra.mxu1 %v568_v4  ;;  %v565_v9 = vld [vmem:[#allocation5 + $0x10] sm:$0xff]   ;;  %v571_v10 = vld [vmem:[#allocation7 + $0x20] sm:$0xff]   ;;  %v566_v11 = vld [vmem:[#allocation5 + $0x8] sm:$0xff]   ;;  %p669_p7 = scmp.lt.s32.totalorder %s427_s25, %s427_s25 }
  0x37   :  { %493 = vmatprep.subr.bf16.mxu0 %v698_v0  ;;  %513 = vmatprep.subr.bf16.mxu1 %v698_v0  ;;  %v572_v12 = vld [vmem:[#allocation7 + $0x18] sm:$0xff]   ;;  %v567_v13 = vld [vmem:[#allocation5] sm:$0xff]   ;;  %v573_v14 = vld [vmem:[#allocation7 + $0x10] sm:$0xff]  }
  0x38   :  { %v81_v15 = vld [vmem:[#allocation2] sm:$0xf]  ;;  %v574_v16 = vld [vmem:[#allocation7 + $0x8] sm:$0xff]   ;;  %v575_v17 = vld [vmem:[#allocation7] sm:$0xff]  }
  0x39   :  { %v576_v18 = vld [vmem:[#allocation8 + $0x38] sm:$0xff]   ;;  %v577_v19 = vld [vmem:[#allocation8 + $0x30] sm:$0xff]   ;;  %v578_v20 = vld [vmem:[#allocation8 + $0x28] sm:$0xff]  }
  0x3a   :  { %494 = vmatpush3.bf16.msra.mxu0 %v561_v2  ;;  %514 = vmatpush3.bf16.msra.mxu1 %v569_v6  ;;  %v579_v21 = vld [vmem:[#allocation8 + $0x20] sm:$0xff]   ;;  %v580_v22 = vld [vmem:[#allocation8 + $0x18] sm:$0xff]   ;;  %v581_v23 = vld [vmem:[#allocation8 + $0x10] sm:$0xff]  }
  0x3b   :  { %495 = vmatprep.subr.bf16.mxu0 %v698_v0  ;;  %515 = vmatprep.subr.bf16.mxu1 %v698_v0  ;;  %v437_v24 = vld [vmem:[%s806_s2] ss:$0 sm:$0xff]  ;;  %v582_v32 = vld [vmem:[#allocation8 + $0x8] sm:$0xff]   ;;  %v583_v33 = vld [vmem:[#allocation8] sm:$0xff]  }
  0x3c   :  { %v446_v34 = vld [vmem:[%s808_s4] ss:$0 sm:$0xff]  ;;  %s664_s4 = scalar_lea.vmem %s427_s25, 128 }
  0x3d   :  { %v455_v42 = vld [vmem:[%s810_s6] ss:$0 sm:$0xff]  ;;  %p665_p6 = scmp.ne.s32.totalorder %s427_s25, %s664_s4  ;;  %p670_p8 = scmp.lt.s32.totalorder %s664_s4, %s664_s4 }
  0x3e   :  { %496 = vmatpush3.bf16.msra.mxu0 %v562_v3  ;;  %516 = vmatpush3.bf16.msra.mxu1 %v570_v8 }
  0x3f   :  { %497 = vmatprep.subr.bf16.mxu0 %v698_v0  ;;  %517 = vmatprep.subr.bf16.mxu1 %v698_v0  ;;  %p671_p9 = por %p670_p8, %p669_p7 }
  0x41   :  { %p672_p10 = pnand %p671_p9, %p665_p6 }
  0x42   :  { %498 = vmatpush3.bf16.msra.mxu0 %v563_v5  ;;  %518 = vmatpush3.bf16.msra.mxu1 %v571_v10 }
  0x43   :  { %499 = vmatprep.subr.bf16.mxu0 %v698_v0  ;;  %519 = vmatprep.subr.bf16.mxu1 %v698_v0 }
  0x46   :  { %500 = vmatpush3.bf16.msra.mxu0 %v564_v7  ;;  %520 = vmatpush3.bf16.msra.mxu1 %v572_v12 }
  0x47   :  { %501 = vmatprep.subr.bf16.mxu0 %v698_v0  ;;  %521 = vmatprep.subr.bf16.mxu1 %v698_v0 }
  0x4a   :  { %502 = vmatpush3.bf16.msra.mxu0 %v565_v9  ;;  %522 = vmatpush3.bf16.msra.mxu1 %v573_v14 }
  0x4b   :  { %503 = vmatprep.subr.bf16.mxu0 %v698_v0  ;;  %523 = vmatprep.subr.bf16.mxu1 %v698_v0 }
  0x4e   :  { %504 = vmatpush3.bf16.msra.mxu0 %v566_v11  ;;  %524 = vmatpush3.bf16.msra.mxu1 %v574_v16 }
  0x4f   :  { %505 = vmatprep.subr.bf16.mxu0 %v698_v0  ;;  %525 = vmatprep.subr.bf16.mxu1 %v698_v0 }
  0x52   :  { %506 = vmatpush3.bf16.msra.mxu0 %v567_v13  ;;  %526 = vmatpush3.bf16.msra.mxu1 %v575_v17 }
  0x53   :  { %531 = vmatprep.subr.bf16.mxu0 %v698_v0 }
  0x55   :  { %508 = vmatmul.mubr.bf16.vlgmr.msra.gmra.mxu0 %v81_v15 }
  0x56   :  { %547 = vmatprep.mubr.msk.bf16.mxu0 %vm699_vm0, %v698_v0  ;;  %532 = vmatpush3.bf16.msra.mxu0 %v576_v18 }
  0x57   :  { %533 = vmatprep.subr.bf16.mxu0 %v698_v0 }
  0x5a   :  { %534 = vmatpush3.bf16.msra.mxu0 %v577_v19 }
  0x5b   :  { %535 = vmatprep.subr.bf16.mxu0 %v698_v0 }
  0x5e   :  { %536 = vmatpush3.bf16.msra.mxu0 %v578_v20 }
  0x5f   :  { %537 = vmatprep.subr.bf16.mxu0 %v698_v0 }
  0x62   :  { %538 = vmatpush3.bf16.msra.mxu0 %v579_v21 }
  0x63   :  { %539 = vmatprep.subr.bf16.mxu0 %v698_v0 }
  0x66   :  { %540 = vmatpush3.bf16.msra.mxu0 %v580_v22 }
  0x67   :  { %541 = vmatprep.subr.bf16.mxu0 %v698_v0 }
  0x6a   :  { %542 = vmatpush3.bf16.msra.mxu0 %v581_v23 }
  0x6b   :  { %543 = vmatprep.subr.bf16.mxu0 %v698_v0 }
  0x6e   :  { %544 = vmatpush3.bf16.msra.mxu0 %v582_v32 }
  0x6f   :  { %545 = vmatprep.subr.bf16.mxu0 %v698_v0 }
  0x72   :  { %546 = vmatpush3.bf16.msra.mxu0 %v583_v33 }
 0x115   :  { %v187_v25 = vpop.f32.mrf.mxu0 }
 0x116   :  { %v188_v26 = vadd.f32 %v437_v24, %v187_v25 }
 0x117   :  { %v509_v27 = vpop.f32.mrf.mxu0 }
 0x118   :  { %v193_v28 = vmax.f32 %v188_v26, 0.0 }
 0x119   :  { %v190_v29 = vpop.f32.mrf.mxu0 }
 0x11a   :  { %v194_v30 = vpack.c.bf16 %v193_v28, %v193_v28 }
 0x11b   :  { %v510_v31 = vpop.f32.mrf.mxu0 }
 0x11c   :  { %528 = vmatmul.mubr.bf16.vlgmr.msra.gmra.mxu1 %v194_v30 }
 0x1dc   :  { %v300_v35 = vpop.f32.mrf.mxu1 }
 0x1dd   :  { %v301_v36 = vadd.f32 %v446_v34, %v300_v35 }
 0x1de   :  { %v529_v37 = vpop.f32.mrf.mxu1 }
 0x1df   :  { %v306_v38 = vmax.f32 %v301_v36, 0.0 }
 0x1e0   :  { %v303_v39 = vpop.f32.mrf.mxu1 }
 0x1e1   :  { %v307_v40 = vpack.c.bf16 %v306_v38, %v306_v38 }
 0x1e2   :  { %v530_v41 = vpop.f32.mrf.mxu1 }
 0x1e3   :  { %548 = vmatmul.mubr.bf16.vlgmr.msra.gmra.mxu0 %v307_v40 }
 0x2a3   :  { %v413_v43 = vpop.f32.mrf.mxu0 }
 0x2a4   :  { %v414_v44 = vadd.f32 %v455_v42, %v413_v43 }
 0x2a5   :  { %v549_v45 = vpop.f32.mrf.mxu0 }
 0x2a6   :  { %419 = vst [vmem:[#allocation10] sm:$0xff] %v414_v44 }
 0x2a7   :  { %v416_v46 = vpop.f32.mrf.mxu0 }
 0x2a8   :  { %675 = shalt.err (!%p672_p10)
}
 0x2a9   :  { %429 = dma.vmem_to_hbm [thread:$0]  %s427_s25, 128, %s811_s7, [#allocation4]   ;;  %v550_v47 = vpop.f32.mrf.mxu0 }
 0x2aa   :  { %690 = dma.done.wait [#allocation4], 128  }
 0x2ab   :  { %691 = vsyncadd [#allocation4], 4294967168 }
 0x2ac   :  { %433 = vsyncpa [#allocation3], 1 }
 0x2ad   :  { %434 = vsyncpa [#allocation6], 1 }
 0x2ae   :  { %435 = vsyncpa [#allocation9], 1 }
 0x2af   :  { %436 = vsyncpa [#allocation4], 1 }

// kernel: tpu_custom_call.1
= control target key start
LH: loop header
LB: loop body
LE: loop exit
PB: predicated region body
PF: predicated region fallthrough
CT: control target
= control target key end

     0   :  { %12 = vsyncpa [#allocation3], 0  ;;  %s804_s0 = inlined_call_operand.hbm [shape: bf16[8,128], index: 0, kind: input, shape index: {}]   ;;  %s805_s1 = inlined_call_operand.hbm [shape: bf16[128,128], index: 1, kind: input, shape index: {}]   ;;  %s806_s2 = inlined_call_operand.vmem [shape: f32[1,128], index: 2, kind: input, shape index: {}]   ;;  %s807_s3 = inlined_call_operand.hbm [shape: bf16[128,128], index: 3, kind: input, shape index: {}]   ;;  %s808_s4 = inlined_call_operand.vmem [shape: f32[1,128], index: 4, kind: input, shape index: {}]   ;;  %s809_s5 = inlined_call_operand.hbm [shape: bf16[128,128], index: 5, kind: input, shape index: {}]   ;;  %s810_s6 = inlined_call_operand.vmem [shape: f32[1,128], index: 6, kind: input, shape index: {}]   ;;  %s811_s7 = inlined_call_operand.hbm [shape: f32[8,128], index: 7, kind: output, shape index: {}]  }
   0x1   :  { %13 = vsyncpa [#allocation6], 0 }
   0x2   :  { %14 = vsyncpa [#allocation9], 0 }
   0x3   :  { %15 = vsyncpa [#allocation4], 0  ;;  %s692_s24 = smov [#allocation5]  }
   0x4   :  { %s31_s25 = sshll.u32 %s692_s24, 4  ;;  %s32_s25 = int_to_ptr.vmem [resolvable:$true] %s31_s25 }
   0x5   :  { %s592_s26 = scalar_lea.vmem %s32_s25, 1024  ;;  %p597_p1 = scmp.lt.s32.totalorder %s32_s25, %s32_s25 }
   0x6   :  { %p593_p0 = scmp.ne.s32.totalorder %s32_s25, %s592_s26  ;;  %p598_p2 = scmp.lt.s32.totalorder %s592_s26, %s592_s26 }
   0x8   :  { %p599_p3 = por %p598_p2, %p597_p1 }
   0xa   :  { %p600_p4 = pnand %p599_p3, %p593_p0 }
   0xc   :  { %603 = shalt.err (!%p600_p4)
}
   0xd   :  { %s693_s27 = smov 64   ;;  %s694_s28 = smov 4  }
   0xe   :  { %37 = dma.hbm_to_vmem [thread:$0]  %s805_s1, 1024, %s32_s25, [#allocation6], %s693_s27, %s693_s27, %s694_s28  }
   0xf   :  { %s695_s8 = smov [#allocation2]   ;;  %s696_s10 = smov [#allocation7]  }
  0x10   :  { %s22_s9 = sshll.u32 %s695_s8, 4  ;;  %s45_s11 = sshll.u32 %s696_s10, 4  ;;  %s23_s9 = int_to_ptr.vmem [resolvable:$true] %s22_s9  ;;  %s46_s11 = int_to_ptr.vmem [resolvable:$true] %s45_s11 }
  0x11   :  { %s612_s12 = scalar_lea.vmem %s23_s9, 64  ;;  %p617_p6 = scmp.lt.s32.totalorder %s23_s9, %s23_s9 }
  0x12   :  { %p613_p5 = scmp.ne.s32.totalorder %s23_s9, %s612_s12  ;;  %p618_p7 = scmp.lt.s32.totalorder %s612_s12, %s612_s12 }
  0x14   :  { %p619_p8 = por %p618_p7, %p617_p6 }
  0x16   :  { %p620_p9 = pnand %p619_p8, %p613_p5 }
  0x18   :  { %623 = shalt.err (!%p620_p9)
}
  0x19   :  { %25 = dma.hbm_to_vmem [thread:$0]  %s804_s0, 64, %s23_s9, [#allocation3]  }
  0x1a   :  { %s632_s15 = scalar_lea.vmem %s46_s11, 1024  ;;  %p637_p11 = scmp.lt.s32.totalorder %s46_s11, %s46_s11 }
  0x1b   :  { %p633_p10 = scmp.ne.s32.totalorder %s46_s11, %s632_s15  ;;  %p638_p12 = scmp.lt.s32.totalorder %s632_s15, %s632_s15 }
  0x1d   :  { %p639_p13 = por %p638_p12, %p637_p11 }
  0x1f   :  { %p640_p0 = pnand %p639_p13, %p633_p10 }
  0x21   :  { %643 = shalt.err (!%p640_p0)
}
  0x22   :  { %51 = dma.hbm_to_vmem [thread:$0]  %s807_s3, 1024, %s46_s11, [#allocation6], %s693_s27, %s693_s27, %s694_s28  }
  0x23   :  { %s697_s17 = smov [#allocation8]  }
  0x24   :  { %s59_s18 = sshll.u32 %s697_s17, 4  ;;  %s60_s18 = int_to_ptr.vmem [resolvable:$true] %s59_s18 }
  0x25   :  { %s652_s19 = scalar_lea.vmem %s60_s18, 1024  ;;  %p657_p2 = scmp.lt.s32.totalorder %s60_s18, %s60_s18 }
  0x26   :  { %p653_p1 = scmp.ne.s32.totalorder %s60_s18, %s652_s19  ;;  %p658_p3 = scmp.lt.s32.totalorder %s652_s19, %s652_s19 }
  0x28   :  { %p659_p4 = por %p658_p3, %p657_p2 }
  0x2a   :  { %p660_p5 = pnand %p659_p4, %p653_p1 }
  0x2c   :  { %663 = shalt.err (!%p660_p5)
}
  0x2d   :  { %65 = dma.hbm_to_vmem [thread:$0]  %s809_s5, 1024, %s60_s18, [#allocation9], %s693_s27, %s693_s27, %s694_s28  }
  0x2e   :  { %684 = dma.done.wait [#allocation3], 64  }
  0x2f   :  { %685 = vsyncadd [#allocation3], 4294967232 }
  0x30   :  { %686 = dma.done.wait [#allocation6], 2048  }
  0x31   :  { %687 = vsyncadd [#allocation6], 4294965248 }
  0x32   :  { %688 = dma.done.wait [#allocation9], 1024  }
  0x33   :  { %689 = vsyncadd [#allocation9], 4294966272  ;;  %v698_v0 = vmov 0.0   ;;  %vm699_vm0 = vmmov 0   ;;  %v560_v1 = vld [vmem:[#allocation5 + $0x38] sm:$0xff]   ;;  %v561_v2 = vld [vmem:[#allocation5 + $0x30] sm:$0xff]  }
  0x34   :  { %491 = vmatprep.subr.bf16.mxu0 %v698_v0  ;;  %507 = vmatprep.mubr.msk.bf16.mxu0 %vm699_vm0, %v698_v0  ;;  %v562_v3 = vld [vmem:[#allocation5 + $0x28] sm:$0xff]   ;;  %v568_v4 = vld [vmem:[#allocation7 + $0x38] sm:$0xff]   ;;  %v563_v5 = vld [vmem:[#allocation5 + $0x20] sm:$0xff]   ;;  %s700_s24 = smov [#allocation10]  }
  0x35   :  { %511 = vmatprep.subr.bf16.mxu1 %v698_v0  ;;  %527 = vmatprep.mubr.msk.bf16.mxu1 %vm699_vm0, %v698_v0  ;;  %v569_v6 = vld [vmem:[#allocation7 + $0x30] sm:$0xff]   ;;  %v564_v7 = vld [vmem:[#allocation5 + $0x18] sm:$0xff]   ;;  %v570_v8 = vld [vmem:[#allocation7 + $0x28] sm:$0xff]   ;;  %s426_s25 = sshll.u32 %s700_s24, 4  ;;  %s427_s25 = int_to_ptr.vmem [resolvable:$true] %s426_s25 }
  0x36   :  { %492 = vmatpush3.bf16.msra.mxu0 %v560_v1  ;;  %512 = vmatpush3.bf16.msra.mxu1 %v568_v4  ;;  %v565_v9 = vld [vmem:[#allocation5 + $0x10] sm:$0xff]   ;;  %v571_v10 = vld [vmem:[#allocation7 + $0x20] sm:$0xff]   ;;  %v566_v11 = vld [vmem:[#allocation5 + $0x8] sm:$0xff]   ;;  %p669_p7 = scmp.lt.s32.totalorder %s427_s25, %s427_s25 }
  0x37   :  { %493 = vmatprep.subr.bf16.mxu0 %v698_v0  ;;  %513 = vmatprep.subr.bf16.mxu1 %v698_v0  ;;  %v572_v12 = vld [vmem:[#allocation7 + $0x18] sm:$0xff]   ;;  %v567_v13 = vld [vmem:[#allocation5] sm:$0xff]   ;;  %v573_v14 = vld [vmem:[#allocation7 + $0x10] sm:$0xff]  }
  0x38   :  { %v81_v15 = vld [vmem:[#allocation2] sm:$0xf]  ;;  %v574_v16 = vld [vmem:[#allocation7 + $0x8] sm:$0xff]   ;;  %v575_v17 = vld [vmem:[#allocation7] sm:$0xff]  }
  0x39   :  { %v576_v18 = vld [vmem:[#allocation8 + $0x38] sm:$0xff]   ;;  %v577_v19 = vld [vmem:[#allocation8 + $0x30] sm:$0xff]   ;;  %v578_v20 = vld [vmem:[#allocation8 + $0x28] sm:$0xff]  }
  0x3a   :  { %494 = vmatpush3.bf16.msra.mxu0 %v561_v2  ;;  %514 = vmatpush3.bf16.msra.mxu1 %v569_v6  ;;  %v579_v21 = vld [vmem:[#allocation8 + $0x20] sm:$0xff]   ;;  %v580_v22 = vld [vmem:[#allocation8 + $0x18] sm:$0xff]   ;;  %v581_v23 = vld [vmem:[#allocation8 + $0x10] sm:$0xff]  }
  0x3b   :  { %495 = vmatprep.subr.bf16.mxu0 %v698_v0  ;;  %515 = vmatprep.subr.bf16.mxu1 %v698_v0  ;;  %v437_v24 = vld [vmem:[%s806_s2] ss:$0 sm:$0xff]  ;;  %v582_v32 = vld [vmem:[#allocation8 + $0x8] sm:$0xff]   ;;  %v583_v33 = vld [vmem:[#allocation8] sm:$0xff]  }
  0x3c   :  { %v446_v34 = vld [vmem:[%s808_s4] ss:$0 sm:$0xff]  ;;  %s664_s4 = scalar_lea.vmem %s427_s25, 128 }
  0x3d   :  { %v455_v42 = vld [vmem:[%s810_s6] ss:$0 sm:$0xff]  ;;  %p665_p6 = scmp.ne.s32.totalorder %s427_s25, %s664_s4  ;;  %p670_p8 = scmp.lt.s32.totalorder %s664_s4, %s664_s4 }
  0x3e   :  { %496 = vmatpush3.bf16.msra.mxu0 %v562_v3  ;;  %516 = vmatpush3.bf16.msra.mxu1 %v570_v8 }
  0x3f   :  { %497 = vmatprep.subr.bf16.mxu0 %v698_v0  ;;  %517 = vmatprep.subr.bf16.mxu1 %v698_v0  ;;  %p671_p9 = por %p670_p8, %p669_p7 }
  0x41   :  { %p672_p10 = pnand %p671_p9, %p665_p6 }
  0x42   :  { %498 = vmatpush3.bf16.msra.mxu0 %v563_v5  ;;  %518 = vmatpush3.bf16.msra.mxu1 %v571_v10 }
  0x43   :  { %499 = vmatprep.subr.bf16.mxu0 %v698_v0  ;;  %519 = vmatprep.subr.bf16.mxu1 %v698_v0 }
  0x46   :  { %500 = vmatpush3.bf16.msra.mxu0 %v564_v7  ;;  %520 = vmatpush3.bf16.msra.mxu1 %v572_v12 }
  0x47   :  { %501 = vmatprep.subr.bf16.mxu0 %v698_v0  ;;  %521 = vmatprep.subr.bf16.mxu1 %v698_v0 }
  0x4a   :  { %502 = vmatpush3.bf16.msra.mxu0 %v565_v9  ;;  %522 = vmatpush3.bf16.msra.mxu1 %v573_v14 }
  0x4b   :  { %503 = vmatprep.subr.bf16.mxu0 %v698_v0  ;;  %523 = vmatprep.subr.bf16.mxu1 %v698_v0 }
  0x4e   :  { %504 = vmatpush3.bf16.msra.mxu0 %v566_v11  ;;  %524 = vmatpush3.bf16.msra.mxu1 %v574_v16 }
  0x4f   :  { %505 = vmatprep.subr.bf16.mxu0 %v698_v0  ;;  %525 = vmatprep.subr.bf16.mxu1 %v698_v0 }
  0x52   :  { %506 = vmatpush3.bf16.msra.mxu0 %v567_v13  ;;  %526 = vmatpush3.bf16.msra.mxu1 %v575_v17 }
  0x53   :  { %531 = vmatprep.subr.bf16.mxu0 %v698_v0 }
  0x55   :  { %508 = vmatmul.mubr.bf16.vlgmr.msra.gmra.mxu0 %v81_v15 }
  0x56   :  { %547 = vmatprep.mubr.msk.bf16.mxu0 %vm699_vm0, %v698_v0  ;;  %532 = vmatpush3.bf16.msra.mxu0 %v576_v18 }
  0x57   :  { %533 = vmatprep.subr.bf16.mxu0 %v698_v0 }
  0x5a   :  { %534 = vmatpush3.bf16.msra.mxu0 %v577_v19 }
  0x5b   :  { %535 = vmatprep.subr.bf16.mxu0 %v698_v0 }
  0x5e   :  { %536 = vmatpush3.bf16.msra.mxu0 %v578_v20 }
  0x5f   :  { %537 = vmatprep.subr.bf16.mxu0 %v698_v0 }
  0x62   :  { %538 = vmatpush3.bf16.msra.mxu0 %v579_v21 }
  0x63   :  { %539 = vmatprep.subr.bf16.mxu0 %v698_v0 }
  0x66   :  { %540 = vmatpush3.bf16.msra.mxu0 %v580_v22 }
  0x67   :  { %541 = vmatprep.subr.bf16.mxu0 %v698_v0 }
  0x6a   :  { %542 = vmatpush3.bf16.msra.mxu0 %v581_v23 }
  0x6b   :  { %543 = vmatprep.subr.bf16.mxu0 %v698_v0 }
  0x6e   :  { %544 = vmatpush3.bf16.msra.mxu0 %v582_v32 }
  0x6f   :  { %545 = vmatprep.subr.bf16.mxu0 %v698_v0 }
  0x72   :  { %546 = vmatpush3.bf16.msra.mxu0 %v583_v33 }
 0x115   :  { %v187_v25 = vpop.f32.mrf.mxu0 }
 0x116   :  { %v188_v26 = vadd.f32 %v437_v24, %v187_v25 }
 0x117   :  { %v509_v27 = vpop.f32.mrf.mxu0 }
 0x118   :  { %v193_v28 = vmax.f32 %v188_v26, 0.0 }
 0x119   :  { %v190_v29 = vpop.f32.mrf.mxu0 }
 0x11a   :  { %v194_v30 = vpack.c.bf16 %v193_v28, %v193_v28 }
 0x11b   :  { %v510_v31 = vpop.f32.mrf.mxu0 }
 0x11c   :  { %528 = vmatmul.mubr.bf16.vlgmr.msra.gmra.mxu1 %v194_v30 }
 0x1dc   :  { %v300_v35 = vpop.f32.mrf.mxu1 }
 0x1dd   :  { %v301_v36 = vadd.f32 %v446_v34, %v300_v35 }
 0x1de   :  { %v529_v37 = vpop.f32.mrf.mxu1 }
 0x1df   :  { %v306_v38 = vmax.f32 %v301_v36, 0.0 }
 0x1e0   :  { %v303_v39 = vpop.f32.mrf.mxu1 }
 0x1e1   :  { %v307_v40 = vpack.c.bf16 %v306_v38, %v306_v38 }
 0x1e2   :  { %v530_v41 = vpop.f32.mrf.mxu1 }
 0x1e3   :  { %548 = vmatmul.mubr.bf16.vlgmr.msra.gmra.mxu0 %v307_v40 }
 0x2a3   :  { %v413_v43 = vpop.f32.mrf.mxu0 }
 0x2a4   :  { %v414_v44 = vadd.f32 %v455_v42, %v413_v43 }
 0x2a5   :  { %v549_v45 = vpop.f32.mrf.mxu0 }
 0x2a6   :  { %419 = vst [vmem:[#allocation10] sm:$0xff] %v414_v44 }
 0x2a7   :  { %v416_v46 = vpop.f32.mrf.mxu0 }
 0x2a8   :  { %675 = shalt.err (!%p672_p10)
}
 0x2a9   :  { %429 = dma.vmem_to_hbm [thread:$0]  %s427_s25, 128, %s811_s7, [#allocation4]   ;;  %v550_v47 = vpop.f32.mrf.mxu0 }
 0x2aa   :  { %690 = dma.done.wait [#allocation4], 128  }
 0x2ab   :  { %691 = vsyncadd [#allocation4], 4294967168 }
 0x2ac   :  { %433 = vsyncpa [#allocation3], 1 }
 0x2ad   :  { %434 = vsyncpa [#allocation6], 1 }
 0x2ae   :  { %435 = vsyncpa [#allocation9], 1 }
 0x2af   :  { %436 = vsyncpa [#allocation4], 1 }

</bundles_post_ra>
